<compile_context>
chip_gen: v7x
topology: tpu7x:2x2x1
jax: 0.10.0
libtpu: 0.0.40
codegen_flags: <defaults>
</compile_context>

<pallas_src>
import math
import functools
import numpy as np

import jax
import jax.numpy as jnp
from jax import lax
from jax.experimental import pallas as pl
from jax.experimental.pallas import tpu as pltpu


# ----------------------------------------------------------------------------
# Fused kernel: conv-as-matmul + BatchNorm3d (batch stats) + LIAF recurrence.
# ----------------------------------------------------------------------------
def _liaf_fused_kernel(dec_ref, w_ref, p_ref, gamma_ref, beta_ref, out_ref,
                       *, batch, time_steps, spatial, eps, thresh):
    # dec_ref:   (1,)            f32  SMEM   sigmoid(decay)
    # w_ref:     (Cout, K)       bf16 VMEM   flattened conv weight
    # p_ref:     (K, N)          bf16 VMEM   im2col patches, N = B*T*Ho*Wo,
    #                                        columns ordered (b, t, h, w)
    # gamma_ref: (Cout, 1)       f32  VMEM
    # beta_ref:  (Cout, 1)       f32  VMEM
    # out_ref:   (B, Cout, T*S)  f32  VMEM   torch layout (free reshape outside)
    cout = w_ref.shape[0]

    # Conv for every timestep at once: one lane-dense MXU matmul, f32 acc.
    syn = jnp.dot(w_ref[...], p_ref[...], preferred_element_type=jnp.float32)
    n_cols = syn.shape[1]
    inv_n = 1.0 / float(n_cols)

    # Exact per-channel BatchNorm batch statistics: the whole reduction domain
    # is on-chip (no grid). Biased variance (train mode), clamped >= 0.
    s1 = jnp.sum(syn, axis=1, keepdims=True)
    s2 = jnp.sum(syn * syn, axis=1, keepdims=True)
    mean = s1 * inv_n
    var = jnp.maximum(s2 * inv_n - mean * mean, 0.0)
    scale = gamma_ref[...] * lax.rsqrt(var + eps)          # (Cout, 1)
    shift = beta_ref[...] - mean * scale                   # (Cout, 1)
    # Hoist (Cout,1)->(Cout,S) broadcasts out of the unrolled loops
    # (JAX does not CSE broadcast_in_dim).
    scale_b = jnp.broadcast_to(scale, (cout, spatial))
    shift_b = jnp.broadcast_to(shift, (cout, spatial))

    dec = dec_ref[0]
    for b in range(batch):                                 # static -> unrolled
        base = b * time_steps * spatial
        mem = syn[:, base:base + spatial] * scale_b + shift_b
        out_ref[b, :, 0:spatial] = jnp.maximum(mem, 0.0)   # actFun = torch.relu
        for t in range(1, time_steps):
            # mem * dec * (1 - spike)  ==  where(mem > thresh, 0, dec) * mem
            keep = jnp.where(mem > thresh, 0.0, dec)
            lo = base + t * spatial
            x_t = syn[:, lo:lo + spatial] * scale_b + shift_b
            mem = mem * keep + x_t
            out_ref[b, :, t * spatial:(t + 1) * spatial] = jnp.maximum(mem, 0.0)


# ----------------------------------------------------------------------------
# Wrapper
# ----------------------------------------------------------------------------
def liaf_conv_cell_forward(inp, w, b, gamma, beta, decay,
                           stride=(1, 1), padding=(1, 1)):
    """inp: (B, C_in, T, H, W) float32. Returns (B, C_out, T, Hout, Wout)."""
    # Training-mode BatchNorm3d (batch statistics) removes any per-channel
    # constant, so the conv bias cancels exactly; drop it.
    # (NOT valid for eval-mode running-stats BN.)
    del b

    B, Cin, T, H, W = inp.shape
    Cout, _, kh, kw = w.shape
    sh, sw = stride
    ph, pw = padding
    Hout = (H + 2 * ph - kh) // sh + 1
    Wout = (W + 2 * pw - kw) // sw + 1
    S = Hout * Wout
    N = B * T * S
    K = Cin * kh * kw

    # Rough fused-footprint upper bound: patches(bf16) + weight + syn/out/temps.
    fused_bytes = K * N * 2 + Cout * K * 2 + 3 * Cout * N * 4 + B * Cout * T * S * 4
    if fused_bytes > 24 * 1024 * 1024:   # safe for v7x's smaller VMEM
        # TODO(synk): fall back to an R-tiled two-kernel split (conv + partial
        # stats, then BN + recurrence) when the fused footprint exceeds VMEM.
        raise NotImplementedError("fused LIAFConvCell kernel: shape too large for VMEM")

    # ---- im2col directly in (K, N) order: K=(cin,ki,kj), N=(b,t,h,w) ----
    # TODO(synk): at large H,W replace this XLA glue with an implicit GEMM
    # inside the kernel (accumulate kh*kw shifted (Cout,Cin)@(Cin,N) dots from
    # the padded activation) to avoid materializing K-times-expanded patches.
    x = jnp.transpose(inp, (1, 0, 2, 3, 4))                       # (Cin,B,T,H,W)
    x = jnp.pad(x, ((0, 0), (0, 0), (0, 0), (ph, ph), (pw, pw)))
    cols = [x[:, :, :, i:i + sh * Hout:sh, j:j + sw * Wout:sw]
            for i in range(kh) for j in range(kw)]
    patches = jnp.stack(cols, axis=1)                             # (Cin,KK,B,T,Ho,Wo)
    patches = patches.reshape(K, N).astype(jnp.bfloat16)

    # torch weight (Cout, Cin, kh, kw) -> (Cout, K), same (cin, ki, kj) order.
    w_flat = w.reshape(Cout, K).astype(jnp.bfloat16)
    dec = jnp.reshape(jax.nn.sigmoid(decay).astype(jnp.float32), (1,))
    gamma2 = gamma.astype(jnp.float32).reshape(Cout, 1)
    beta2 = beta.astype(jnp.float32).reshape(Cout, 1)

    kernel = functools.partial(_liaf_fused_kernel, batch=B, time_steps=T,
                               spatial=S, eps=1e-5, thresh=0.5)
    out = pl.pallas_call(
        kernel,
        out_shape=jax.ShapeDtypeStruct((B, Cout, T * S), jnp.float32),
        in_specs=[
            pl.BlockSpec(memory_space=pltpu.MemorySpace.SMEM),    # sigmoid(decay)
            pl.BlockSpec(memory_space=pltpu.MemorySpace.VMEM),    # weight
            pl.BlockSpec(memory_space=pltpu.MemorySpace.VMEM),    # patches
            pl.BlockSpec(memory_space=pltpu.MemorySpace.VMEM),    # gamma
            pl.BlockSpec(memory_space=pltpu.MemorySpace.VMEM),    # beta
        ],
        out_specs=pl.BlockSpec(memory_space=pltpu.MemorySpace.VMEM),
    )(dec, w_flat, patches, gamma2, beta2)

    # (B, Cout, T*S) -> (B, Cout, T, Hout, Wout): free reshape, no transpose.
    return out.reshape(B, Cout, T, Hout, Wout)


# ----------------------------------------------------------------------------
# Pure-JAX reference (mirrors the PyTorch forward; bf16 conv inputs with f32
# accumulation so the comparison is precision-matched).
# ----------------------------------------------------------------------------
def liaf_reference(inp, w, b, gamma, beta, decay, stride=(1, 1), padding=(1, 1)):
    B, Cin, T, H, W = inp.shape
    ph, pw = padding
    x16 = inp.astype(jnp.bfloat16)
    w16 = w.astype(jnp.bfloat16)
    syn = []
    for t in range(T):
        y = lax.conv_general_dilated(
            x16[:, :, t], w16, window_strides=stride,
            padding=[(ph, ph), (pw, pw)],
            dimension_numbers=("NCHW", "OIHW", "NCHW"),
            preferred_element_type=jnp.float32)
        syn.append(y + b[None, :, None, None])              # bias kept here
    syn = jnp.stack(syn, axis=2)                            # (B,Cout,T,H',W')
    mean = syn.mean(axis=(0, 2, 3, 4), keepdims=True)
    var = syn.var(axis=(0, 2, 3, 4), keepdims=True)         # biased (train mode)
    synn = (syn - mean) / jnp.sqrt(var + 1e-5)
    synn = synn * gamma[None, :, None, None, None] + beta[None, :, None, None, None]

    dec = jnp.reshape(jax.nn.sigmoid(decay), ())
    mem = synn[:, :, 0]
    spike = (mem > 0.5).astype(jnp.float32)
    outs = [jnp.maximum(mem, 0.0)]
    for t in range(1, T):
        mem = mem * dec * (1.0 - spike) + synn[:, :, t]
        spike = (mem > 0.5).astype(jnp.float32)
        outs.append(jnp.maximum(mem, 0.0))
    return jnp.stack(outs, axis=2)


if __name__ == "__main__":
    # Shapes consistent with LIAFConvCell(inChannels=4, outChannels=8,
    # kernelSize=(3,3), stride=(1,1), padding=(1,1), inputSize=(16,16),
    # useBatchNorm=True, usePool=False, dropOut=0, actFun=torch.relu).
    # TODO(synk): usePool / dropout paths are disabled by the module defaults
    # and not implemented here.
    B, Cin, Cout, T, H, W = 2, 4, 8, 4, 16, 16
    kh = kw = 3

    key = jax.random.PRNGKey(0)
    k1, k2, k3, k4, k5 = jax.random.split(key, 5)
    bound = 1.0 / math.sqrt(Cin * kh * kw)
    w = jax.random.uniform(k1, (Cout, Cin, kh, kw), jnp.float32, -bound, bound)
    b = jax.random.uniform(k2, (Cout,), jnp.float32, -bound, bound)
    gamma = (1.0 + 0.1 * jax.random.normal(k3, (Cout,))).astype(jnp.float32)
    beta = (0.1 * jax.random.normal(k4, (Cout,))).astype(jnp.float32)
    decay = jnp.ones((1,), jnp.float32) * 0.5               # nn.Parameter(ones(1)*0.5)
    x = jax.random.normal(k5, (B, Cin, T, H, W), jnp.float32)

    fwd = jax.jit(functools.partial(liaf_conv_cell_forward,
                                    stride=(1, 1), padding=(1, 1)))
    out = fwd(x, w, b, gamma, beta, decay)
    jax.block_until_ready(out)
    assert out.shape == (B, Cout, T, H, W), out.shape

    ref = liaf_reference(x, w, b, gamma, beta, decay)
    out_np = np.asarray(out)
    ref_np = np.asarray(ref)
    abs_err = np.abs(out_np - ref_np)
    tol = 2e-3 + 2e-3 * np.abs(ref_np)
    # The LIF spike threshold is a hard discontinuity: a membrane value within
    # float-rounding distance of 0.5 may legitimately flip the spike between
    # two matched-precision implementations.  Require the mismatch fraction to
    # be (essentially) zero.
    frac_bad = float(np.mean(abs_err > tol))
    assert frac_bad <= 1e-3, f"mismatch fraction {frac_bad}"

    # Guard against a systematic BatchNorm-statistics drift hiding inside the
    # spike-flip mismatch budget: per-channel output means must agree.
    ch_mean_out = out_np.mean(axis=(0, 2, 3, 4))
    ch_mean_ref = ref_np.mean(axis=(0, 2, 3, 4))
    assert np.allclose(ch_mean_out, ch_mean_ref, atol=1e-2, rtol=1e-2), (
        ch_mean_out, ch_mean_ref)

    print("KERNEL_OK")
</pallas_src>

<mosaic_0001>
module attributes {stable_mosaic.version = 11 : i64} {
  func.func @_liaf_fused_kernel(%arg0: memref<1xf32, #tpu.memory_space<smem>>, %arg1: memref<8x36xbf16, #tpu.memory_space<vmem>>, %arg2: memref<36x2048xbf16, #tpu.memory_space<vmem>>, %arg3: memref<8x1xf32, #tpu.memory_space<vmem>>, %arg4: memref<8x1xf32, #tpu.memory_space<vmem>>, %arg5: memref<2x8x1024xf32, #tpu.memory_space<vmem>>) attributes {dimension_semantics = [], scalar_prefetch = 0 : i64, scratch_operands = 0 : i64, tpu.core_type = #tpu.core_type<tc>} {
    %c0 = arith.constant 0 : index
    %c0_0 = arith.constant 0 : index
    %0 = vector.load %arg1[%c0, %c0_0] : memref<8x36xbf16, #tpu.memory_space<vmem>>, vector<8x36xbf16>
    %c0_1 = arith.constant 0 : index
    %c0_2 = arith.constant 0 : index
    %1 = vector.load %arg2[%c0_1, %c0_2] : memref<36x2048xbf16, #tpu.memory_space<vmem>>, vector<36x2048xbf16>
    %cst = arith.constant dense<0.000000e+00> : vector<8x2048xf32>
    %2 = tpu.matmul %0, %1, %cst {dimension_numbers = #tpu.dot_dimension_numbers<[1], [0], [0], [1], [0, 0, 1, 1], [], []>} : vector<8x36xbf16>, vector<36x2048xbf16>, vector<8x2048xf32> -> vector<8x2048xf32>
    %cst_3 = arith.constant dense<0.000000e+00> : vector<8xf32>
    %3 = vector.multi_reduction <add>, %2, %cst_3 [1] : vector<8x2048xf32> to vector<8xf32>
    %4 = vector.shape_cast %3 : vector<8xf32> to vector<8x1xf32>
    %5 = arith.mulf %2, %2 : vector<8x2048xf32>
    %cst_4 = arith.constant dense<0.000000e+00> : vector<8xf32>
    %6 = vector.multi_reduction <add>, %5, %cst_4 [1] : vector<8x2048xf32> to vector<8xf32>
    %7 = vector.shape_cast %6 : vector<8xf32> to vector<8x1xf32>
    %cst_5 = arith.constant 4.8828125E-4 : f32
    %8 = vector.broadcast %cst_5 : f32 to vector<8x1xf32>
    %9 = arith.mulf %4, %8 : vector<8x1xf32>
    %cst_6 = arith.constant 4.8828125E-4 : f32
    %10 = vector.broadcast %cst_6 : f32 to vector<8x1xf32>
    %11 = arith.mulf %7, %10 : vector<8x1xf32>
    %12 = arith.mulf %9, %9 : vector<8x1xf32>
    %13 = arith.subf %11, %12 : vector<8x1xf32>
    %cst_7 = arith.constant 0.000000e+00 : f32
    %14 = vector.broadcast %cst_7 : f32 to vector<8x1xf32>
    %15 = arith.maximumf %13, %14 : vector<8x1xf32>
    %c0_8 = arith.constant 0 : index
    %c0_9 = arith.constant 0 : index
    %16 = vector.load %arg3[%c0_8, %c0_9] : memref<8x1xf32, #tpu.memory_space<vmem>>, vector<8x1xf32>
    %cst_10 = arith.constant 9.99999974E-6 : f32
    %17 = vector.broadcast %cst_10 : f32 to vector<8x1xf32>
    %18 = arith.addf %15, %17 : vector<8x1xf32>
    %19 = math.rsqrt %18 : vector<8x1xf32>
    %20 = arith.mulf %16, %19 : vector<8x1xf32>
    %c0_11 = arith.constant 0 : index
    %c0_12 = arith.constant 0 : index
    %21 = vector.load %arg4[%c0_11, %c0_12] : memref<8x1xf32, #tpu.memory_space<vmem>>, vector<8x1xf32>
    %22 = arith.mulf %9, %20 : vector<8x1xf32>
    %23 = arith.subf %21, %22 : vector<8x1xf32>
    %24 = vector.shape_cast %20 : vector<8x1xf32> to vector<8x1xf32>
    %25 = vector.broadcast %24 : vector<8x1xf32> to vector<8x256xf32>
    %26 = vector.shape_cast %23 : vector<8x1xf32> to vector<8x1xf32>
    %27 = vector.broadcast %26 : vector<8x1xf32> to vector<8x256xf32>
    %c0_13 = arith.constant 0 : index
    %28 = memref.load %arg0[%c0_13] : memref<1xf32, #tpu.memory_space<smem>>
    %29 = vector.extract_strided_slice %2 {offsets = [0, 0], sizes = [8, 256], strides = [1, 1]} : vector<8x2048xf32> to vector<8x256xf32>
    %30 = arith.mulf %29, %25 : vector<8x256xf32>
    %31 = arith.addf %30, %27 : vector<8x256xf32>
    %cst_14 = arith.constant 0.000000e+00 : f32
    %32 = vector.broadcast %cst_14 : f32 to vector<8x256xf32>
    %33 = arith.maximumf %31, %32 : vector<8x256xf32>
    %c0_15 = arith.constant 0 : index
    %c0_16 = arith.constant 0 : index
    %c0_17 = arith.constant 0 : index
    %34 = vector.load %arg5[%c0_15, %c0_16, %c0_17] : memref<2x8x1024xf32, #tpu.memory_space<vmem>>, vector<1x8x256xf32>
    %35 = vector.shape_cast %34 : vector<1x8x256xf32> to vector<8x256xf32>
    %36 = vector.shape_cast %33 : vector<8x256xf32> to vector<1x8x256xf32>
    tpu.vector_store %arg5[%c0_15, %c0_16, %c0_17], %36 {strides = array<i32>} : memref<2x8x1024xf32, #tpu.memory_space<vmem>>, vector<1x8x256xf32>,
    %cst_18 = arith.constant 5.000000e-01 : f32
    %37 = vector.broadcast %cst_18 : f32 to vector<8x256xf32>
    %38 = arith.cmpf ogt, %31, %37 : vector<8x256xf32>
    %cst_19 = arith.constant 0.000000e+00 : f32
    %39 = vector.broadcast %cst_19 : f32 to vector<8x256xf32>
    %40 = vector.broadcast %28 : f32 to vector<8x256xf32>
    %41 = arith.select %38, %39, %40 : vector<8x256xi1>, vector<8x256xf32>
    %42 = vector.extract_strided_slice %2 {offsets = [0, 256], sizes = [8, 256], strides = [1, 1]} : vector<8x2048xf32> to vector<8x256xf32>
    %43 = arith.mulf %42, %25 : vector<8x256xf32>
    %44 = arith.addf %43, %27 : vector<8x256xf32>
    %45 = arith.mulf %31, %41 : vector<8x256xf32>
    %46 = arith.addf %45, %44 : vector<8x256xf32>
    %cst_20 = arith.constant 0.000000e+00 : f32
    %47 = vector.broadcast %cst_20 : f32 to vector<8x256xf32>
    %48 = arith.maximumf %46, %47 : vector<8x256xf32>
    %c0_21 = arith.constant 0 : index
    %c0_22 = arith.constant 0 : index
    %c256 = arith.constant 256 : index
    %49 = vector.load %arg5[%c0_21, %c0_22, %c256] : memref<2x8x1024xf32, #tpu.memory_space<vmem>>, vector<1x8x256xf32>
    %50 = vector.shape_cast %49 : vector<1x8x256xf32> to vector<8x256xf32>
    %51 = vector.shape_cast %48 : vector<8x256xf32> to vector<1x8x256xf32>
    tpu.vector_store %arg5[%c0_21, %c0_22, %c256], %51 {strides = array<i32>} : memref<2x8x1024xf32, #tpu.memory_space<vmem>>, vector<1x8x256xf32>,
    %cst_23 = arith.constant 5.000000e-01 : f32
    %52 = vector.broadcast %cst_23 : f32 to vector<8x256xf32>
    %53 = arith.cmpf ogt, %46, %52 : vector<8x256xf32>
    %cst_24 = arith.constant 0.000000e+00 : f32
    %54 = vector.broadcast %cst_24 : f32 to vector<8x256xf32>
    %55 = vector.broadcast %28 : f32 to vector<8x256xf32>
    %56 = arith.select %53, %54, %55 : vector<8x256xi1>, vector<8x256xf32>
    %57 = vector.extract_strided_slice %2 {offsets = [0, 512], sizes = [8, 256], strides = [1, 1]} : vector<8x2048xf32> to vector<8x256xf32>
    %58 = arith.mulf %57, %25 : vector<8x256xf32>
    %59 = arith.addf %58, %27 : vector<8x256xf32>
    %60 = arith.mulf %46, %56 : vector<8x256xf32>
    %61 = arith.addf %60, %59 : vector<8x256xf32>
    %cst_25 = arith.constant 0.000000e+00 : f32
    %62 = vector.broadcast %cst_25 : f32 to vector<8x256xf32>
    %63 = arith.maximumf %61, %62 : vector<8x256xf32>
    %c0_26 = arith.constant 0 : index
    %c0_27 = arith.constant 0 : index
    %c512 = arith.constant 512 : index
    %64 = vector.load %arg5[%c0_26, %c0_27, %c512] : memref<2x8x1024xf32, #tpu.memory_space<vmem>>, vector<1x8x256xf32>
    %65 = vector.shape_cast %64 : vector<1x8x256xf32> to vector<8x256xf32>
    %66 = vector.shape_cast %63 : vector<8x256xf32> to vector<1x8x256xf32>
    tpu.vector_store %arg5[%c0_26, %c0_27, %c512], %66 {strides = array<i32>} : memref<2x8x1024xf32, #tpu.memory_space<vmem>>, vector<1x8x256xf32>,
    %cst_28 = arith.constant 5.000000e-01 : f32
    %67 = vector.broadcast %cst_28 : f32 to vector<8x256xf32>
    %68 = arith.cmpf ogt, %61, %67 : vector<8x256xf32>
    %cst_29 = arith.constant 0.000000e+00 : f32
    %69 = vector.broadcast %cst_29 : f32 to vector<8x256xf32>
    %70 = vector.broadcast %28 : f32 to vector<8x256xf32>
    %71 = arith.select %68, %69, %70 : vector<8x256xi1>, vector<8x256xf32>
    %72 = vector.extract_strided_slice %2 {offsets = [0, 768], sizes = [8, 256], strides = [1, 1]} : vector<8x2048xf32> to vector<8x256xf32>
    %73 = arith.mulf %72, %25 : vector<8x256xf32>
    %74 = arith.addf %73, %27 : vector<8x256xf32>
    %75 = arith.mulf %61, %71 : vector<8x256xf32>
    %76 = arith.addf %75, %74 : vector<8x256xf32>
    %cst_30 = arith.constant 0.000000e+00 : f32
    %77 = vector.broadcast %cst_30 : f32 to vector<8x256xf32>
    %78 = arith.maximumf %76, %77 : vector<8x256xf32>
    %c0_31 = arith.constant 0 : index
    %c0_32 = arith.constant 0 : index
    %c768 = arith.constant 768 : index
    %79 = vector.load %arg5[%c0_31, %c0_32, %c768] : memref<2x8x1024xf32, #tpu.memory_space<vmem>>, vector<1x8x256xf32>
    %80 = vector.shape_cast %79 : vector<1x8x256xf32> to vector<8x256xf32>
    %81 = vector.shape_cast %78 : vector<8x256xf32> to vector<1x8x256xf32>
    tpu.vector_store %arg5[%c0_31, %c0_32, %c768], %81 {strides = array<i32>} : memref<2x8x1024xf32, #tpu.memory_space<vmem>>, vector<1x8x256xf32>,
    %82 = vector.extract_strided_slice %2 {offsets = [0, 1024], sizes = [8, 256], strides = [1, 1]} : vector<8x2048xf32> to vector<8x256xf32>
    %83 = arith.mulf %82, %25 : vector<8x256xf32>
    %84 = arith.addf %83, %27 : vector<8x256xf32>
    %cst_33 = arith.constant 0.000000e+00 : f32
    %85 = vector.broadcast %cst_33 : f32 to vector<8x256xf32>
    %86 = arith.maximumf %84, %85 : vector<8x256xf32>
    %c1 = arith.constant 1 : index
    %c0_34 = arith.constant 0 : index
    %c0_35 = arith.constant 0 : index
    %87 = vector.load %arg5[%c1, %c0_34, %c0_35] : memref<2x8x1024xf32, #tpu.memory_space<vmem>>, vector<1x8x256xf32>
    %88 = vector.shape_cast %87 : vector<1x8x256xf32> to vector<8x256xf32>
    %89 = vector.shape_cast %86 : vector<8x256xf32> to vector<1x8x256xf32>
    tpu.vector_store %arg5[%c1, %c0_34, %c0_35], %89 {strides = array<i32>} : memref<2x8x1024xf32, #tpu.memory_space<vmem>>, vector<1x8x256xf32>,
    %cst_36 = arith.constant 5.000000e-01 : f32
    %90 = vector.broadcast %cst_36 : f32 to vector<8x256xf32>
    %91 = arith.cmpf ogt, %84, %90 : vector<8x256xf32>
    %cst_37 = arith.constant 0.000000e+00 : f32
    %92 = vector.broadcast %cst_37 : f32 to vector<8x256xf32>
    %93 = vector.broadcast %28 : f32 to vector<8x256xf32>
    %94 = arith.select %91, %92, %93 : vector<8x256xi1>, vector<8x256xf32>
    %95 = vector.extract_strided_slice %2 {offsets = [0, 1280], sizes = [8, 256], strides = [1, 1]} : vector<8x2048xf32> to vector<8x256xf32>
    %96 = arith.mulf %95, %25 : vector<8x256xf32>
    %97 = arith.addf %96, %27 : vector<8x256xf32>
    %98 = arith.mulf %84, %94 : vector<8x256xf32>
    %99 = arith.addf %98, %97 : vector<8x256xf32>
    %cst_38 = arith.constant 0.000000e+00 : f32
    %100 = vector.broadcast %cst_38 : f32 to vector<8x256xf32>
    %101 = arith.maximumf %99, %100 : vector<8x256xf32>
    %c1_39 = arith.constant 1 : index
    %c0_40 = arith.constant 0 : index
    %c256_41 = arith.constant 256 : index
    %102 = vector.load %arg5[%c1_39, %c0_40, %c256_41] : memref<2x8x1024xf32, #tpu.memory_space<vmem>>, vector<1x8x256xf32>
    %103 = vector.shape_cast %102 : vector<1x8x256xf32> to vector<8x256xf32>
    %104 = vector.shape_cast %101 : vector<8x256xf32> to vector<1x8x256xf32>
    tpu.vector_store %arg5[%c1_39, %c0_40, %c256_41], %104 {strides = array<i32>} : memref<2x8x1024xf32, #tpu.memory_space<vmem>>, vector<1x8x256xf32>,
    %cst_42 = arith.constant 5.000000e-01 : f32
    %105 = vector.broadcast %cst_42 : f32 to vector<8x256xf32>
    %106 = arith.cmpf ogt, %99, %105 : vector<8x256xf32>
    %cst_43 = arith.constant 0.000000e+00 : f32
    %107 = vector.broadcast %cst_43 : f32 to vector<8x256xf32>
    %108 = vector.broadcast %28 : f32 to vector<8x256xf32>
    %109 = arith.select %106, %107, %108 : vector<8x256xi1>, vector<8x256xf32>
    %110 = vector.extract_strided_slice %2 {offsets = [0, 1536], sizes = [8, 256], strides = [1, 1]} : vector<8x2048xf32> to vector<8x256xf32>
    %111 = arith.mulf %110, %25 : vector<8x256xf32>
    %112 = arith.addf %111, %27 : vector<8x256xf32>
    %113 = arith.mulf %99, %109 : vector<8x256xf32>
    %114 = arith.addf %113, %112 : vector<8x256xf32>
    %cst_44 = arith.constant 0.000000e+00 : f32
    %115 = vector.broadcast %cst_44 : f32 to vector<8x256xf32>
    %116 = arith.maximumf %114, %115 : vector<8x256xf32>
    %c1_45 = arith.constant 1 : index
    %c0_46 = arith.constant 0 : index
    %c512_47 = arith.constant 512 : index
    %117 = vector.load %arg5[%c1_45, %c0_46, %c512_47] : memref<2x8x1024xf32, #tpu.memory_space<vmem>>, vector<1x8x256xf32>
    %118 = vector.shape_cast %117 : vector<1x8x256xf32> to vector<8x256xf32>
    %119 = vector.shape_cast %116 : vector<8x256xf32> to vector<1x8x256xf32>
    tpu.vector_store %arg5[%c1_45, %c0_46, %c512_47], %119 {strides = array<i32>} : memref<2x8x1024xf32, #tpu.memory_space<vmem>>, vector<1x8x256xf32>,
    %cst_48 = arith.constant 5.000000e-01 : f32
    %120 = vector.broadcast %cst_48 : f32 to vector<8x256xf32>
    %121 = arith.cmpf ogt, %114, %120 : vector<8x256xf32>
    %cst_49 = arith.constant 0.000000e+00 : f32
    %122 = vector.broadcast %cst_49 : f32 to vector<8x256xf32>
    %123 = vector.broadcast %28 : f32 to vector<8x256xf32>
    %124 = arith.select %121, %122, %123 : vector<8x256xi1>, vector<8x256xf32>
    %125 = vector.extract_strided_slice %2 {offsets = [0, 1792], sizes = [8, 256], strides = [1, 1]} : vector<8x2048xf32> to vector<8x256xf32>
    %126 = arith.mulf %125, %25 : vector<8x256xf32>
    %127 = arith.addf %126, %27 : vector<8x256xf32>
    %128 = arith.mulf %114, %124 : vector<8x256xf32>
    %129 = arith.addf %128, %127 : vector<8x256xf32>
    %cst_50 = arith.constant 0.000000e+00 : f32
    %130 = vector.broadcast %cst_50 : f32 to vector<8x256xf32>
    %131 = arith.maximumf %129, %130 : vector<8x256xf32>
    %c1_51 = arith.constant 1 : index
    %c0_52 = arith.constant 0 : index
    %c768_53 = arith.constant 768 : index
    %132 = vector.load %arg5[%c1_51, %c0_52, %c768_53] : memref<2x8x1024xf32, #tpu.memory_space<vmem>>, vector<1x8x256xf32>
    %133 = vector.shape_cast %132 : vector<1x8x256xf32> to vector<8x256xf32>
    %134 = vector.shape_cast %131 : vector<8x256xf32> to vector<1x8x256xf32>
    tpu.vector_store %arg5[%c1_51, %c0_52, %c768_53], %134 {strides = array<i32>} : memref<2x8x1024xf32, #tpu.memory_space<vmem>>, vector<1x8x256xf32>,
    return
  }
}

</mosaic_0001>

<bundles_post_ra>
// kernel: liaf_conv_cell_forward.1
= control target key start
LH: loop header
LB: loop body
LE: loop exit
PB: predicated region body
PF: predicated region fallthrough
CT: control target
= control target key end

     0   :  { %v928_v3 = vmov 0   ;;  %vm267_vm0 = vcmask 1041408   ;;  %vm263_vm1 = vcmask 293888   ;;  %s1299_s2 = inlined_call_operand.vmem [shape: bf16[36,2048], index: 2, kind: input, shape index: {}]   ;;  %s1300_s1 = inlined_call_operand.vmem [shape: bf16[8,36], index: 1, kind: input, shape index: {}]   ;;  %s1301_s3 = inlined_call_operand.vmem [shape: f32[8,1], index: 3, kind: input, shape index: {}]   ;;  %s1302_s4 = inlined_call_operand.vmem [shape: f32[8,1], index: 4, kind: input, shape index: {}]   ;;  %s1303_s0 = inlined_call_operand.<no memory space> [shape: f32[1], index: 0, kind: input, shape index: {}]   ;;  %s1304_s5 = inlined_call_operand.vmem [shape: f32[2,8,1024], index: 5, kind: output, shape index: {}]  }
   0x1   :  { %v23_v0 = vld [vmem:[%s1299_s2] sm:$0xff]  ;;  %v24_v2 = vld [vmem:[%s1299_s2 + $0x8] sm:$0xff]  ;;  %348 = vmatprep.mubr.bf16.mxu0 %v928_v3  ;;  %389 = vmatprep.mubr.bf16.mxu1 %v928_v3  ;;  %v25_v23 = vld [vmem:[%s1299_s2 + $0x10] sm:$0xff] }
   0x2   :  { %v31_v1 = vld [vmem:[%s1299_s2 + $0x40] sm:$0xff]  ;;  %v32_v6 = vld [vmem:[%s1299_s2 + $0x48] sm:$0xff]  ;;  %908 = vset.pattern.permute.xlu1 %v928_v3  ;;  %909 = vset.pattern.permute.xlu0 %v928_v3  ;;  %v33_v24 = vld [vmem:[%s1299_s2 + $0x50] sm:$0xff] }
   0x3   :  { %v836_v4 = vcombine.high %v23_v0, %v31_v1  ;;  %v835_v5 = vcombine.low %v23_v0, %v31_v1  ;;  %v39_v7 = vld [vmem:[%s1299_s2 + $0x80] sm:$0xff]  ;;  %v838_v9 = vcombine.high %v24_v2, %v32_v6  ;;  %v837_v10 = vcombine.low %v24_v2, %v32_v6  ;;  %v40_v12 = vld [vmem:[%s1299_s2 + $0x88] sm:$0xff]  ;;  %v26_v25 = vld [vmem:[%s1299_s2 + $0x18] sm:$0xff] }
   0x4   :  { %v47_v8 = vld [vmem:[%s1299_s2 + $0xc0] sm:$0xff]  ;;  %v48_v13 = vld [vmem:[%s1299_s2 + $0xc8] sm:$0xff]  ;;  %v34_v26 = vld [vmem:[%s1299_s2 + $0x58] sm:$0xff]  ;;  %v840_v28 = vcombine.high %v25_v23, %v33_v24  ;;  %v839_v36 = vcombine.low %v25_v23, %v33_v24 }
   0x5   :  { %v852_v11 = vcombine.high %v39_v7, %v47_v8  ;;  %v55_v14 = vld [vmem:[%s1299_s2 + $0x100] sm:$0x33]  ;;  %316 = vmatprep.subr.bf16.mxu0 %v836_v4  ;;  %v854_v15 = vcombine.high %v40_v12, %v48_v13  ;;  %v56_v16 = vld [vmem:[%s1299_s2 + $0x108] sm:$0x33]  ;;  %357 = vmatprep.subr.bf16.mxu1 %v838_v9  ;;  %v851_v17 = vcombine.low %v39_v7, %v47_v8  ;;  %v41_v31 = vld [vmem:[%s1299_s2 + $0x90] sm:$0xff] }
   0x6   :  { %317 = vmatpush1.bf16.msra.mxu0 %v835_v5  ;;  %358 = vmatpush1.bf16.msra.mxu1 %v837_v10  ;;  %v853_v18 = vcombine.low %v40_v12, %v48_v13  ;;  %v868_v19 = vcombine.high %v55_v14, %v55_v14  ;;  %v867_v20 = vcombine.low %v55_v14, %v55_v14  ;;  %v49_v32 = vld [vmem:[%s1299_s2 + $0xd0] sm:$0xff]  ;;  %v42_v33 = vld [vmem:[%s1299_s2 + $0x98] sm:$0xff]  ;;  %v1024_v35 = vld [vmem:[%s1300_s1] sm:$0xf] }
   0x7   :  { %318 = vmatprep.subr.bf16.mxu0 %v852_v11  ;;  %359 = vmatprep.subr.bf16.mxu1 %v854_v15  ;;  %v870_v21 = vcombine.high %v56_v16, %v56_v16  ;;  %v869_v22 = vcombine.low %v56_v16, %v56_v16  ;;  %v842_v30 = vcombine.high %v26_v25, %v34_v26  ;;  %v50_v34 = vld [vmem:[%s1299_s2 + $0xd8] sm:$0xff]  ;;  %v57_v40 = vld [vmem:[%s1299_s2 + $0x110] sm:$0x33]  ;;  %v27_v48 = vld [vmem:[%s1299_s2 + $0x20] sm:$0xff] }
   0x8   :  { %v269_v27 = vsel %vm267_vm0, %v867_v20, 0  ;;  %v841_v37 = vcombine.low %v26_v25, %v34_v26  ;;  %v856_v38 = vcombine.high %v41_v31, %v49_v32  ;;  %v858_v39 = vcombine.high %v42_v33, %v50_v34  ;;  %v58_v41 = vld [vmem:[%s1299_s2 + $0x118] sm:$0x33]  ;;  %v35_v49 = vld [vmem:[%s1299_s2 + $0x60] sm:$0xff]  ;;  %v28_v50 = vld [vmem:[%s1299_s2 + $0x28] sm:$0xff] }
   0x9   :  { %v275_v29 = vsel %vm267_vm0, %v869_v22, 0  ;;  %v855_v42 = vcombine.low %v41_v31, %v49_v32  ;;  %v857_v43 = vcombine.low %v42_v33, %v50_v34  ;;  %v872_v44 = vcombine.high %v57_v40, %v57_v40  ;;  %v36_v51 = vld [vmem:[%s1299_s2 + $0x68] sm:$0xff]  ;;  %v43_v56 = vld [vmem:[%s1299_s2 + $0xa0] sm:$0xff]  ;;  %v29_v9 = vld [vmem:[%s1299_s2 + $0x30] sm:$0xff] }
   0xa   :  { %319 = vmatpush1.bf16.msra.mxu0 %v851_v17  ;;  %360 = vmatpush1.bf16.msra.mxu1 %v853_v18  ;;  %v871_v45 = vcombine.low %v57_v40, %v57_v40  ;;  %v874_v46 = vcombine.high %v58_v41, %v58_v41  ;;  %v873_v47 = vcombine.low %v58_v41, %v58_v41  ;;  %v51_v57 = vld [vmem:[%s1299_s2 + $0xe0] sm:$0xff]  ;;  %v44_v58 = vld [vmem:[%s1299_s2 + $0xa8] sm:$0xff]  ;;  %v37_v10 = vld [vmem:[%s1299_s2 + $0x70] sm:$0xff] }
   0xb   :  { %883 = vmatprep.subr.msk.bf16.mxu0 %vm267_vm0, %v868_v19  ;;  %885 = vmatprep.subr.msk.bf16.mxu1 %vm267_vm0, %v870_v21  ;;  %v844_v53 = vcombine.high %v27_v48, %v35_v49  ;;  %v846_v55 = vcombine.high %v28_v50, %v36_v51  ;;  %v52_v59 = vld [vmem:[%s1299_s2 + $0xe8] sm:$0xff]  ;;  %v843_v60 = vcombine.low %v27_v48, %v35_v49  ;;  %v59_v0 = vld [vmem:[%s1299_s2 + $0x120] sm:$0x33]  ;;  %v30_v11 = vld [vmem:[%s1299_s2 + $0x38] sm:$0xff] }
   0xc   :  { %v281_v52 = vsel %vm267_vm0, %v871_v45, 0  ;;  %v287_v54 = vsel %vm267_vm0, %v873_v47, 0  ;;  %v845_v61 = vcombine.low %v28_v50, %v36_v51  ;;  %v860_v62 = vcombine.high %v43_v56, %v51_v57  ;;  %v60_v1 = vld [vmem:[%s1299_s2 + $0x128] sm:$0x33]  ;;  %v38_v12 = vld [vmem:[%s1299_s2 + $0x78] sm:$0xff]  ;;  %v45_v17 = vld [vmem:[%s1299_s2 + $0xb0] sm:$0xff] }
   0xd   :  { %v862_v63 = vcombine.high %v44_v58, %v52_v59  ;;  %v859_v2 = vcombine.low %v43_v56, %v51_v57  ;;  %v861_v4 = vcombine.low %v44_v58, %v52_v59  ;;  %v876_v5 = vcombine.high %v59_v0, %v59_v0  ;;  %v53_v18 = vld [vmem:[%s1299_s2 + $0xf0] sm:$0xff]  ;;  %v46_v19 = vld [vmem:[%s1299_s2 + $0xb8] sm:$0xff] }
   0xe   :  { %321 = vmatpush1.bf16.msra.mxu0 %v269_v27  ;;  %362 = vmatpush1.bf16.msra.mxu1 %v275_v29  ;;  %v875_v6 = vcombine.low %v59_v0, %v59_v0  ;;  %v878_v7 = vcombine.high %v60_v1, %v60_v1  ;;  %v877_v8 = vcombine.low %v60_v1, %v60_v1  ;;  %v54_v20 = vld [vmem:[%s1299_s2 + $0xf8] sm:$0xff]  ;;  %v61_v25 = vld [vmem:[%s1299_s2 + $0x130] sm:$0x33] }
   0xf   :  { %398 = vmatprep.subr.bf16.mxu0 %v840_v28  ;;  %439 = vmatprep.subr.bf16.mxu1 %v842_v30  ;;  %v848_v14 = vcombine.high %v29_v9, %v37_v10  ;;  %v850_v16 = vcombine.high %v30_v11, %v38_v12  ;;  %v847_v21 = vcombine.low %v29_v9, %v37_v10  ;;  %v62_v26 = vld [vmem:[%s1299_s2 + $0x138] sm:$0x33] }
  0x10   :  { %v293_v13 = vsel %vm267_vm0, %v875_v6, 0  ;;  %v299_v15 = vsel %vm267_vm0, %v877_v8, 0  ;;  %v849_v22 = vcombine.low %v30_v11, %v38_v12  ;;  %v864_v23 = vcombine.high %v45_v17, %v53_v18 }
  0x11   :  { %884 = vmatmul.mubr.msk.bf16.vlgmr.msra.gmra.mrb[0].mxu0 %vm263_vm1, %v1024_v35  ;;  %886 = vmatmul.mubr.msk.bf16.vlgmr.msra.gmra.mrb[0].mxu1 %vm263_vm1, %v1024_v35  ;;  %v866_v24 = vcombine.high %v46_v19, %v54_v20  ;;  %v863_v27 = vcombine.low %v45_v17, %v53_v18  ;;  %v865_v28 = vcombine.low %v46_v19, %v54_v20 }
  0x12   :  { %399 = vmatpush1.bf16.msra.mxu0 %v839_v36  ;;  %440 = vmatpush1.bf16.msra.mxu1 %v841_v37  ;;  %v880_v29 = vcombine.high %v61_v25, %v61_v25  ;;  %v879_v30 = vcombine.low %v61_v25, %v61_v25  ;;  %v882_v31 = vcombine.high %v62_v26, %v62_v26 }
  0x13   :  { %400 = vmatprep.subr.bf16.mxu0 %v856_v38  ;;  %441 = vmatprep.subr.bf16.mxu1 %v858_v39  ;;  %v881_v32 = vcombine.low %v62_v26, %v62_v26 }
  0x14   :  { %430 = vmatprep.mubr.bf16.mxu0 %v928_v3  ;;  %471 = vmatprep.mubr.bf16.mxu1 %v928_v3  ;;  %v305_v33 = vsel %vm267_vm0, %v879_v30, 0 }
  0x15   :  { %v311_v34 = vsel %vm267_vm0, %v881_v32, 0 }
  0x16   :  { %401 = vmatpush1.bf16.msra.mxu0 %v855_v42  ;;  %442 = vmatpush1.bf16.msra.mxu1 %v857_v43 }
  0x17   :  { %887 = vmatprep.subr.msk.bf16.mxu0 %vm267_vm0, %v872_v44  ;;  %889 = vmatprep.subr.msk.bf16.mxu1 %vm267_vm0, %v874_v46 }
  0x1a   :  { %403 = vmatpush1.bf16.msra.mxu0 %v281_v52  ;;  %444 = vmatpush1.bf16.msra.mxu1 %v287_v54 }
  0x1b   :  { %480 = vmatprep.subr.bf16.mxu0 %v844_v53  ;;  %521 = vmatprep.subr.bf16.mxu1 %v846_v55 }
  0x1d   :  { %888 = vmatmul.mubr.msk.bf16.vlgmr.msra.gmra.mrb[4].mxu0 %vm263_vm1, %v1024_v35  ;;  %890 = vmatmul.mubr.msk.bf16.vlgmr.msra.gmra.mrb[4].mxu1 %vm263_vm1, %v1024_v35 }
  0x1e   :  { %481 = vmatpush1.bf16.msra.mxu0 %v843_v60  ;;  %522 = vmatpush1.bf16.msra.mxu1 %v845_v61 }
  0x1f   :  { %482 = vmatprep.subr.bf16.mxu0 %v860_v62  ;;  %523 = vmatprep.subr.bf16.mxu1 %v862_v63 }
  0x20   :  { %512 = vmatprep.mubr.bf16.mxu0 %v928_v3  ;;  %553 = vmatprep.mubr.bf16.mxu1 %v928_v3 }
  0x22   :  { %483 = vmatpush1.bf16.msra.mxu0 %v859_v2  ;;  %524 = vmatpush1.bf16.msra.mxu1 %v861_v4 }
  0x23   :  { %891 = vmatprep.subr.msk.bf16.mxu0 %vm267_vm0, %v876_v5  ;;  %893 = vmatprep.subr.msk.bf16.mxu1 %vm267_vm0, %v878_v7 }
  0x26   :  { %485 = vmatpush1.bf16.msra.mxu0 %v293_v13  ;;  %526 = vmatpush1.bf16.msra.mxu1 %v299_v15 }
  0x27   :  { %562 = vmatprep.subr.bf16.mxu0 %v848_v14  ;;  %603 = vmatprep.subr.bf16.mxu1 %v850_v16 }
  0x29   :  { %892 = vmatmul.mubr.msk.bf16.vlgmr.msra.gmra.mrb[8].mxu0 %vm263_vm1, %v1024_v35  ;;  %894 = vmatmul.mubr.msk.bf16.vlgmr.msra.gmra.mrb[8].mxu1 %vm263_vm1, %v1024_v35 }
  0x2a   :  { %563 = vmatpush1.bf16.msra.mxu0 %v847_v21  ;;  %604 = vmatpush1.bf16.msra.mxu1 %v849_v22 }
  0x2b   :  { %564 = vmatprep.subr.bf16.mxu0 %v864_v23  ;;  %605 = vmatprep.subr.bf16.mxu1 %v866_v24 }
  0x2c   :  { %594 = vmatprep.mubr.bf16.mxu0 %v928_v3  ;;  %635 = vmatprep.mubr.bf16.mxu1 %v928_v3 }
  0x2e   :  { %565 = vmatpush1.bf16.msra.mxu0 %v863_v27  ;;  %606 = vmatpush1.bf16.msra.mxu1 %v865_v28 }
  0x2f   :  { %895 = vmatprep.subr.msk.bf16.mxu0 %vm267_vm0, %v880_v29  ;;  %897 = vmatprep.subr.msk.bf16.mxu1 %vm267_vm0, %v882_v31 }
  0x32   :  { %567 = vmatpush1.bf16.msra.mxu0 %v305_v33  ;;  %608 = vmatpush1.bf16.msra.mxu1 %v311_v34 }
  0x35   :  { %896 = vmatmul.mubr.msk.bf16.vlgmr.msra.gmra.mrb[12].mxu0 %vm263_vm1, %v1024_v35  ;;  %898 = vmatmul.mubr.msk.bf16.vlgmr.msra.gmra.mrb[12].mxu1 %vm263_vm1, %v1024_v35 }
  0xe4   :  { %v1126_v36 = vpop.f32.mrb[0].mxu0  ;;  %v1132_v38 = vpop.f32.mrb[0].mxu1 }
  0xe5   :  { %v661_v3 = vmul.f32 %v1126_v36, %v1126_v36  ;;  %v1130_v37 = vpop.f32.mrb[1].mxu0  ;;  %v663_v42 = vmul.f32 %v1132_v38, %v1132_v38  ;;  %v1140_v35 = vpop.f32.mrb[1].mxu1 }
  0xe6   :  { %v644_v39 = vadd.f32 %v1130_v37, %v1126_v36  ;;  %v662_v40 = vmul.f32 %v1130_v37, %v1130_v37  ;;  %v354_v41 = vpop.f32.mrb[2].mxu0  ;;  %v395_v44 = vpop.f32.mrb[2].mxu1  ;;  %v664_v47 = vmul.f32 %v1140_v35, %v1140_v35 }
  0xe7   :  { %v355_v43 = vpop.f32.mrb[3].mxu0  ;;  %v396_v48 = vpop.f32.mrb[3].mxu1 }
  0xe8   :  { %v677_v45 = vadd.f32 %v662_v40, %v661_v3  ;;  %v645_v46 = vadd.f32 %v644_v39, %v1132_v38 }
  0xea   :  { %v678_v49 = vadd.f32 %v677_v45, %v663_v42  ;;  %v646_v50 = vadd.f32 %v645_v46, %v1140_v35 }
  0xec   :  { %v679_v51 = vadd.f32 %v678_v49, %v664_v47 }
  0xf0   :  { %v1146_v52 = vpop.f32.mrb[4].mxu0  ;;  %v1153_v56 = vpop.f32.mrb[4].mxu1 }
  0xf1   :  { %v647_v53 = vadd.f32 %v646_v50, %v1146_v52  ;;  %v665_v54 = vmul.f32 %v1146_v52, %v1146_v52  ;;  %v1151_v55 = vpop.f32.mrb[5].mxu0  ;;  %v1157_v59 = vpop.f32.mrb[5].mxu1  ;;  %v667_v62 = vmul.f32 %v1153_v56, %v1153_v56 }
  0xf2   :  { %v666_v57 = vmul.f32 %v1151_v55, %v1151_v55  ;;  %v436_v58 = vpop.f32.mrb[6].mxu0  ;;  %v477_v0 = vpop.f32.mrb[6].mxu1  ;;  %v668_v5 = vmul.f32 %v1157_v59, %v1157_v59 }
  0xf3   :  { %v680_v60 = vadd.f32 %v679_v51, %v665_v54  ;;  %v648_v61 = vadd.f32 %v647_v53, %v1151_v55  ;;  %v437_v63 = vpop.f32.mrb[7].mxu0  ;;  %v478_v1 = vpop.f32.mrb[7].mxu1  ;;  %v699_v0 = vld [vmem:[%s1301_s3] sm:$0xff] }
  0xf5   :  { %v681_v2 = vadd.f32 %v680_v60, %v666_v57  ;;  %v649_v4 = vadd.f32 %v648_v61, %v1153_v56 }
  0xf7   :  { %v682_v6 = vadd.f32 %v681_v2, %v667_v62  ;;  %v650_v7 = vadd.f32 %v649_v4, %v1157_v59  ;;  %v703_v4 = vld [vmem:[%s1302_s4] sm:$0xff] }
  0xf9   :  { %v683_v8 = vadd.f32 %v682_v6, %v668_v5 }
  0xfc   :  { %v1166_v9 = vpop.f32.mrb[8].mxu0  ;;  %v1173_v13 = vpop.f32.mrb[8].mxu1 }
  0xfd   :  { %v651_v10 = vadd.f32 %v650_v7, %v1166_v9  ;;  %v669_v11 = vmul.f32 %v1166_v9, %v1166_v9  ;;  %v1171_v12 = vpop.f32.mrb[9].mxu0  ;;  %v1177_v16 = vpop.f32.mrb[9].mxu1  ;;  %v671_v19 = vmul.f32 %v1173_v13, %v1173_v13 }
  0xfe   :  { %v670_v14 = vmul.f32 %v1171_v12, %v1171_v12  ;;  %v518_v15 = vpop.f32.mrb[10].mxu0  ;;  %v559_v21 = vpop.f32.mrb[10].mxu1  ;;  %v672_v25 = vmul.f32 %v1177_v16, %v1177_v16 }
  0xff   :  { %v684_v17 = vadd.f32 %v683_v8, %v669_v11  ;;  %v652_v18 = vadd.f32 %v651_v10, %v1171_v12  ;;  %v519_v20 = vpop.f32.mrb[11].mxu0  ;;  %v560_v22 = vpop.f32.mrb[11].mxu1  ;;  %v1197_v11 = vstv %s1303_s0 }
 0x101   :  { %v685_v23 = vadd.f32 %v684_v17, %v670_v14  ;;  %v653_v24 = vadd.f32 %v652_v18, %v1173_v13 }
 0x103   :  { %v686_v26 = vadd.f32 %v685_v23, %v671_v19  ;;  %v654_v27 = vadd.f32 %v653_v24, %v1177_v16 }
 0x105   :  { %v687_v28 = vadd.f32 %v686_v26, %v672_v25 }
 0x108   :  { %v596_v29 = vpop.f32.mrb[12].mxu0  ;;  %v637_v33 = vpop.f32.mrb[12].mxu1 }
 0x109   :  { %v655_v30 = vadd.f32 %v654_v27, %v596_v29  ;;  %v673_v31 = vmul.f32 %v596_v29, %v596_v29  ;;  %v598_v32 = vpop.f32.mrb[13].mxu0  ;;  %v639_v39 = vpop.f32.mrb[13].mxu1  ;;  %v675_v42 = vmul.f32 %v637_v33, %v637_v33 }
 0x10a   :  { %v674_v34 = vmul.f32 %v598_v32, %v598_v32  ;;  %v600_v3 = vpop.f32.mrb[14].mxu0  ;;  %v641_v44 = vpop.f32.mrb[14].mxu1  ;;  %v676_v49 = vmul.f32 %v639_v39, %v639_v39 }
 0x10b   :  { %v688_v40 = vadd.f32 %v687_v28, %v673_v31  ;;  %v656_v41 = vadd.f32 %v655_v30, %v598_v32  ;;  %v601_v43 = vpop.f32.mrb[15].mxu0  ;;  %v642_v45 = vpop.f32.mrb[15].mxu1 }
 0x10d   :  { %v657_v46 = vadd.f32 %v656_v41, %v637_v33  ;;  %v689_v47 = vadd.f32 %v688_v40, %v674_v34 }
 0x10f   :  { %v658_v48 = vadd.f32 %v657_v46, %v639_v39  ;;  %v690_v50 = vadd.f32 %v689_v47, %v675_v42 }
 0x111   :  { %659 = vadd.xlane.f32.xlu0 %v658_v48  ;;  %v691_v51 = vadd.f32 %v690_v50, %v676_v49 }
 0x115   :  { %692 = vadd.xlane.f32.xlu0 %v691_v51 }
 0x19e   :  { %v660_v53 = vpop.xlane.xlu0 %659 }
 0x19f   :  { %v694_v54 = vmul.f32 0.00048828125, %v660_v53 }
 0x1a1   :  { %v696_v58 = vmul.f32 %v694_v54, %v694_v54 }
 0x1a2   :  { %v693_v57 = vpop.xlane.xlu0 %692 }
 0x1a3   :  { %v695_v60 = vmul.f32 0.00048828125, %v693_v57 }
 0x1a5   :  { %v697_v61 = vsub.f32 %v695_v60, %v696_v58 }
 0x1a7   :  { %v698_v62 = vmax.f32 %v697_v61, 0.0 }
 0x1a9   :  { %v700_v63 = vadd.f32 1e-05, %v698_v62 }
 0x1ab   :  { %926 = vrsqrt.f32 %v700_v63 }
 0x1b5   :  { %v927_v1 = vpop.eup %926 }
 0x1b6   :  { %v702_v2 = vmul.f32 %v927_v1, %v699_v0 }
 0x1b8   :  { %708 = vperm.xlu1 %908, %v702_v2   ;;  %v704_v5 = vmul.f32 %v702_v2, %v694_v54 }
 0x1ba   :  { %v705_v6 = vsub.f32 %v703_v4, %v704_v5 }
 0x1bc   :  { %713 = vperm.xlu1 %908, %v705_v6  }
 0x237   :  { %v709_v7 = vpop.permute.xlu1 %708 }
 0x238   :  { %v717_v8 = vmul.f32 %v709_v7, %v1126_v36  ;;  %v718_v10 = vmul.f32 %v709_v7, %v1130_v37  ;;  %v730_v14 = vmul.f32 %v709_v7, %v1132_v38  ;;  %v731_v15 = vmul.f32 %v709_v7, %v1140_v35 }
 0x239   :  { %v746_v17 = vmul.f32 %v709_v7, %v1146_v52  ;;  %v747_v18 = vmul.f32 %v709_v7, %v1151_v55  ;;  %v1204_v19 = vmul.f32 %v709_v7, %v1153_v56  ;;  %v1207_v36 = vmul.f32 %v709_v7, %v1157_v59 }
 0x23a   :  { %v774_v37 = vmul.f32 %v709_v7, %v1166_v9  ;;  %v775_v20 = vmul.f32 %v709_v7, %v1171_v12  ;;  %v787_v38 = vmul.f32 %v709_v7, %v1173_v13  ;;  %v788_v35 = vmul.f32 %v709_v7, %v1177_v16 }
 0x23b   :  { %v1211_v21 = vpop.permute.xlu1 %713  ;;  %v803_v22 = vmul.f32 %v709_v7, %v596_v29  ;;  %v804_v56 = vmul.f32 %v709_v7, %v598_v32  ;;  %v1217_v23 = vmul.f32 %v709_v7, %v637_v33  ;;  %v1219_v59 = vmul.f32 %v709_v7, %v639_v39 }
 0x23c   :  { %v719_v52 = vadd.f32 %v717_v8, %v1211_v21  ;;  %v720_v55 = vadd.f32 %v718_v10, %v1211_v21  ;;  %v776_v16 = vadd.f32 %v774_v37, %v1211_v21  ;;  %v777_v25 = vadd.f32 %v775_v20, %v1211_v21 }
 0x23d   :  { %v732_v26 = vadd.f32 %v730_v14, %v1211_v21  ;;  %v733_v27 = vadd.f32 %v731_v15, %v1211_v21  ;;  %v789_v39 = vadd.f32 %v787_v38, %v1211_v21  ;;  %v790_v40 = vadd.f32 %v788_v35, %v1211_v21 }
 0x23e   :  { %v721_v24 = vmax.f32 %v719_v52, 0.0  ;;  %v722_v9 = vmax.f32 %v720_v55, 0.0  ;;  %vm725_vm2 = vcmp.gt.f32.partialorder %v719_v52, 0.5  ;;  %vm726_vm3 = vcmp.gt.f32.partialorder %v720_v55, 0.5 }
 0x23f   :  { %v728_v12 = vsel %vm725_vm2, 0.0, %v1197_v11  ;;  %v729_v13 = vsel %vm726_vm3, 0.0, %v1197_v11  ;;  %v778_v30 = vmax.f32 %v776_v16, 0.0  ;;  %v779_v31 = vmax.f32 %v777_v25, 0.0 }
 0x240   :  { %723 = vst [vmem:[%s1304_s5] sm:$0xff] %v721_v24  ;;  %724 = vst [vmem:[%s1304_s5 + $0x8] sm:$0xff] %v722_v9  ;;  %v734_v28 = vmul.f32 %v728_v12, %v719_v52  ;;  %v735_v29 = vmul.f32 %v729_v13, %v720_v55  ;;  %vm783_vm4 = vcmp.gt.f32.partialorder %v776_v16, 0.5  ;;  %vm784_vm5 = vcmp.gt.f32.partialorder %v777_v25, 0.5 }
 0x241   :  { %v785_v34 = vsel %vm783_vm4, 0.0, %v1197_v11  ;;  %v786_v3 = vsel %vm784_vm5, 0.0, %v1197_v11  ;;  %899 = vst [vmem:[%s1304_s5 + $0x40] sm:$0xff] %v778_v30  ;;  %900 = vst [vmem:[%s1304_s5 + $0x48] sm:$0xff] %v779_v31  ;;  %v748_v49 = vadd.f32 %v746_v17, %v1211_v21  ;;  %v749_v50 = vadd.f32 %v747_v18, %v1211_v21 }
 0x242   :  { %v736_v32 = vadd.f32 %v734_v28, %v732_v26  ;;  %v737_v33 = vadd.f32 %v735_v29, %v733_v27  ;;  %v791_v41 = vmul.f32 %v785_v34, %v776_v16  ;;  %v792_v42 = vmul.f32 %v786_v3, %v777_v25 }
 0x243   :  { %v805_v63 = vadd.f32 %v803_v22, %v1211_v21  ;;  %v806_v0 = vadd.f32 %v804_v56, %v1211_v21  ;;  %v764_v14 = vadd.f32 %v1204_v19, %v1211_v21  ;;  %v765_v15 = vadd.f32 %v1207_v36, %v1211_v21 }
 0x244   :  { %v738_v43 = vmax.f32 %v736_v32, 0.0  ;;  %v739_v44 = vmax.f32 %v737_v33, 0.0  ;;  %vm742_vm6 = vcmp.gt.f32.partialorder %v736_v32, 0.5  ;;  %vm743_vm7 = vcmp.gt.f32.partialorder %v737_v33, 0.5 }
 0x245   :  { %v744_v45 = vsel %vm742_vm6, 0.0, %v1197_v11  ;;  %v745_v46 = vsel %vm743_vm7, 0.0, %v1197_v11  ;;  %v793_v47 = vadd.f32 %v791_v41, %v789_v39  ;;  %v794_v48 = vadd.f32 %v792_v42, %v790_v40 }
 0x246   :  { %740 = vst [vmem:[%s1304_s5 + $0x10] sm:$0xff] %v738_v43  ;;  %741 = vst [vmem:[%s1304_s5 + $0x18] sm:$0xff] %v739_v44  ;;  %v750_v51 = vmul.f32 %v744_v45, %v736_v32  ;;  %v751_v53 = vmul.f32 %v745_v46, %v737_v33  ;;  %v821_v19 = vadd.f32 %v1217_v23, %v1211_v21 }
 0x247   :  { %v795_v54 = vmax.f32 %v793_v47, 0.0  ;;  %v796_v57 = vmax.f32 %v794_v48, 0.0  ;;  %vm799_vm8 = vcmp.gt.f32.partialorder %v793_v47, 0.5  ;;  %vm800_vm9 = vcmp.gt.f32.partialorder %v794_v48, 0.5 }
 0x248   :  { %v752_v58 = vadd.f32 %v750_v51, %v748_v49  ;;  %v753_v60 = vadd.f32 %v751_v53, %v749_v50  ;;  %v801_v61 = vsel %vm799_vm8, 0.0, %v1197_v11  ;;  %v802_v62 = vsel %vm800_vm9, 0.0, %v1197_v11 }
 0x249   :  { %901 = vst [vmem:[%s1304_s5 + $0x50] sm:$0xff] %v795_v54  ;;  %902 = vst [vmem:[%s1304_s5 + $0x58] sm:$0xff] %v796_v57  ;;  %v807_v1 = vmul.f32 %v801_v61, %v793_v47  ;;  %v808_v2 = vmul.f32 %v802_v62, %v794_v48  ;;  %v822_v36 = vadd.f32 %v1219_v59, %v1211_v21 }
 0x24a   :  { %v754_v4 = vmax.f32 %v752_v58, 0.0  ;;  %v755_v5 = vmax.f32 %v753_v60, 0.0  ;;  %vm758_vm10 = vcmp.gt.f32.partialorder %v752_v58, 0.5  ;;  %vm759_vm11 = vcmp.gt.f32.partialorder %v753_v60, 0.5 }
 0x24b   :  { %v760_v6 = vsel %vm758_vm10, 0.0, %v1197_v11  ;;  %v761_v7 = vsel %vm759_vm11, 0.0, %v1197_v11  ;;  %v809_v8 = vadd.f32 %v807_v1, %v805_v63  ;;  %v810_v10 = vadd.f32 %v808_v2, %v806_v0 }
 0x24c   :  { %756 = vst [vmem:[%s1304_s5 + $0x20] sm:$0xff] %v754_v4  ;;  %757 = vst [vmem:[%s1304_s5 + $0x28] sm:$0xff] %v755_v5  ;;  %v766_v17 = vmul.f32 %v760_v6, %v752_v58  ;;  %v767_v18 = vmul.f32 %v761_v7, %v753_v60 }
 0x24d   :  { %v811_v37 = vmax.f32 %v809_v8, 0.0  ;;  %v812_v20 = vmax.f32 %v810_v10, 0.0  ;;  %vm815_vm12 = vcmp.gt.f32.partialorder %v809_v8, 0.5  ;;  %vm816_vm13 = vcmp.gt.f32.partialorder %v810_v10, 0.5 }
 0x24e   :  { %v768_v38 = vadd.f32 %v766_v17, %v764_v14  ;;  %v769_v35 = vadd.f32 %v767_v18, %v765_v15  ;;  %v817_v52 = vsel %vm815_vm12, 0.0, %v1197_v11  ;;  %v818_v55 = vsel %vm816_vm13, 0.0, %v1197_v11 }
 0x24f   :  { %903 = vst [vmem:[%s1304_s5 + $0x60] sm:$0xff] %v811_v37  ;;  %904 = vst [vmem:[%s1304_s5 + $0x68] sm:$0xff] %v812_v20  ;;  %v823_v22 = vmul.f32 %v817_v52, %v809_v8  ;;  %v824_v56 = vmul.f32 %v818_v55, %v810_v10 }
 0x250   :  { %v770_v24 = vmax.f32 %v768_v38, 0.0  ;;  %v771_v9 = vmax.f32 %v769_v35, 0.0 }
 0x251   :  { %v825_v12 = vadd.f32 %v823_v22, %v821_v19  ;;  %v826_v11 = vadd.f32 %v824_v56, %v822_v36 }
 0x252   :  { %772 = vst [vmem:[%s1304_s5 + $0x30] sm:$0xff] %v770_v24  ;;  %773 = vst [vmem:[%s1304_s5 + $0x38] sm:$0xff] %v771_v9 }
 0x253   :  { %v827_v13 = vmax.f32 %v825_v12, 0.0  ;;  %v828_v16 = vmax.f32 %v826_v11, 0.0 }
 0x255   :  { %905 = vst [vmem:[%s1304_s5 + $0x70] sm:$0xff] %v827_v13  ;;  %906 = vst [vmem:[%s1304_s5 + $0x78] sm:$0xff] %v828_v16 }

</bundles_post_ra>
